<compile_context>
chip_gen: v5e
topology: v5e:2x2
jax: 0.10.0
libtpu: 0.0.40
codegen_flags: <defaults>
</compile_context>

<pallas_src>
import functools

import jax
import jax.numpy as jnp
from jax.experimental import pallas as pl
from jax.experimental.pallas import tpu as pltpu


def _round_up(x: int, m: int) -> int:
    return (x + m - 1) // m * m


def _avg_readout_kernel(seq_ref, out_ref, acc_ref, *,
                        inv_n: float, n_total: int, tn: int,
                        mask_n_tail: bool):
    # seq_ref: (TB, TN, TD) input tile in VMEM
    # out_ref: (TB, TD) output tile (resident across the reduction axis k)
    # acc_ref: (TB, TD) f32 accumulator scratch
    k = pl.program_id(2)

    @pl.when(k == 0)
    def _init():
        acc_ref[...] = jnp.zeros_like(acc_ref)

    x = seq_ref[...].astype(jnp.float32)  # (TB, TN, TD)

    if mask_n_tail:
        # Last N tile is partial: rows >= (n_total - k*tn) hold unspecified
        # (out-of-bounds) data and must not enter the sum. On full tiles the
        # compare is all-true; cost is free VPU filler under the DMA stream.
        valid_rows = n_total - k * tn
        row_ids = jax.lax.broadcasted_iota(jnp.int32, x.shape, 1)
        x = jnp.where(row_ids < valid_rows, x, 0.0)

    # Partial sum over the node chunk, f32 accumulation for accuracy.
    # TODO(synk): if a bundle dump ever shows XLU binding, defer the
    # cross-sublane reduce to the finalize branch (sublane-partial accumulator).
    acc_ref[...] += jnp.sum(x, axis=1)

    @pl.when(k == pl.num_programs(2) - 1)
    def _finalize():
        # 1/N applied exactly once, using the *true* N.
        out_ref[...] = (acc_ref[...] * inv_n).astype(out_ref.dtype)


def _tpu_budgets():
    """Return (vmem_capacity_bytes, per_input_buffer_budget, is_dual_core)."""
    vmem_cap = 128 * 1024 * 1024
    try:
        info = pltpu.get_tpu_info()
        vmem_cap = int(getattr(info, "vmem_capacity_bytes", vmem_cap))
    except Exception:
        pass
    if vmem_cap <= 64 * 1024 * 1024:
        # v7x-like: 64 MiB VMEM/TC, ~3.2 TB/s HBM, 2 TCs/chip.
        return vmem_cap, 12 * 1024 * 1024, True
    # v5e / v6e: 128 MiB VMEM, 1 TC/chip.
    return vmem_cap, 8 * 1024 * 1024, False


def _pick_tiles(B: int, N: int, D: int, itemsize: int,
                budget: int, want_two_d_tiles: bool):
    # Batch tile: never pad/over-read the batch axis for small B (DMGI uses B=1).
    TB = B if B <= 8 else 8

    # Sublane packing requirement for the dtype (8 f32, 16 bf16, 32 int8/fp8).
    sub = max(8, 32 // max(itemsize, 1))

    # D tile: prefer the full D (long contiguous DMA runs). Only split when
    # even the minimum-TN full-D block would blow the per-buffer budget.
    TD = D
    if TB * sub * TD * itemsize > budget:
        TD = max(128, (budget // (TB * sub * itemsize)) // 128 * 128)
    elif want_two_d_tiles and D >= 256:
        # v7x: make sure the parallel (b, d) grid has >= 2 entries so the
        # second TensorCore isn't idle for the typical B=1 call.
        TD = _round_up(-(-D // 2), 128)

    # N tile: fill the remaining per-buffer budget, rounded to sublane packing.
    tn = budget // max(TB * TD * itemsize, 1)
    tn = max(sub, (tn // sub) * sub)
    TN = min(tn, _round_up(N, sub))
    if TN >= N:
        TN = N  # full reduction axis in one tile; no tail masking needed

    return TB, TN, TD, sub


def avg_readout(seq: jax.Array) -> jax.Array:
    """Mean over axis 1 of a (B, N, D) array, computed in a Pallas TPU kernel."""
    B, N, D = seq.shape
    if N == 0:
        # torch.mean over an empty axis yields NaN.
        return jnp.full((B, D), jnp.nan, dtype=seq.dtype)

    itemsize = jnp.dtype(seq.dtype).itemsize
    vmem_cap, budget, dual_core = _tpu_budgets()
    TB, TN, TD, _ = _pick_tiles(B, N, D, itemsize, budget, dual_core)

    b_tiles = pl.cdiv(B, TB)
    d_tiles = pl.cdiv(D, TD)
    n_tiles = pl.cdiv(N, TN)

    # Output is allocated at tile-padded size (cheap: it is ~N times smaller
    # than the input) so output blocks always divide evenly; sliced at the end.
    B_out = b_tiles * TB
    D_out = d_tiles * TD

    mask_n_tail = (TN < N) and (N % TN != 0)
    # NOTE: inv_n is baked in as a Python float, so the callable specializes
    # (and recompiles) per distinct N — fine for DMGI's fixed graph sizes.
    kernel = functools.partial(
        _avg_readout_kernel,
        inv_n=1.0 / N, n_total=N, tn=TN, mask_n_tail=mask_n_tail)

    # vmem_limit derived from the actual allocation: double-buffered input,
    # double-buffered output block, accumulator, plus margin for compiler
    # internal scratch. Capped well below physical VMEM (64 MiB/TC on v7x).
    in_bytes = TB * TN * TD * itemsize
    out_bytes = TB * TD * itemsize
    acc_bytes = TB * TD * 4
    vmem_limit = 2 * in_bytes + 2 * out_bytes + acc_bytes + (8 << 20)
    vmem_limit = min(max(vmem_limit, 32 << 20), vmem_cap // 2)

    out_p = pl.pallas_call(
        kernel,
        out_shape=jax.ShapeDtypeStruct((B_out, D_out), seq.dtype),
        grid_spec=pltpu.PrefetchScalarGridSpec(
            num_scalar_prefetch=0,
            grid=(b_tiles, d_tiles, n_tiles),
            in_specs=[
                # (TB, TN, TD) chunk: batch-tile b, node-chunk k, D-tile d.
                # TODO(synk): add pipeline_mode=pl.Buffered(3) only if a
                # profile shows exposed DMA at b/d tile boundaries.
                pl.BlockSpec((TB, TN, TD), lambda b, d, k: (b, k, d)),
            ],
            # Output block is revisited (resident) across the reduction axis k.
            out_specs=pl.BlockSpec((TB, TD), lambda b, d, k: (b, d)),
            scratch_shapes=[pltpu.VMEM((TB, TD), jnp.float32)],
        ),
        compiler_params=pltpu.CompilerParams(
            # b/d tiles are independent (megacore-shardable on v7x); the
            # reduction axis must stay "arbitrary".
            dimension_semantics=("parallel", "parallel", "arbitrary"),
            vmem_limit_bytes=int(vmem_limit),
        ),
    )(seq)

    if (B_out, D_out) != (B, D):
        out_p = out_p[:B, :D]
    return out_p


if __name__ == "__main__":
    key = jax.random.PRNGKey(0)
    B, N, D = 2, 8, 32
    seq = jax.random.normal(key, (B, N, D), dtype=jnp.float32)

    out = avg_readout(seq)
    jax.block_until_ready(out)

    # Reference: torch.mean(seq, 1)
    ref = jnp.mean(seq, axis=1)
    assert out.shape == (B, D), out.shape
    assert jnp.allclose(out, ref, atol=1e-6, rtol=1e-6)

    # Extra check on a ragged / larger shape (exercises the in-kernel N-tail
    # mask path and unpadded-input handling) — still tiny, runs in microseconds.
    B2, N2, D2 = 3, 37, 200
    seq2 = jax.random.normal(jax.random.PRNGKey(1), (B2, N2, D2), jnp.float32)
    out2 = avg_readout(seq2)
    jax.block_until_ready(out2)
    assert jnp.allclose(out2, jnp.mean(seq2, axis=1), atol=1e-5, rtol=1e-5)

    print("KERNEL_OK")
</pallas_src>

<mosaic_0001>
module attributes {stable_mosaic.version = 11 : i64} {
  func.func @_avg_readout_kernel(%arg0: i32, %arg1: i32, %arg2: i32, %arg3: memref<2x8x32xf32, #tpu.memory_space<vmem>>, %arg4: memref<2x32xf32, #tpu.memory_space<vmem>>, %arg5: memref<2x32xf32, #tpu.memory_space<vmem>>) attributes {dimension_semantics = [#tpu.dimension_semantics<parallel>, #tpu.dimension_semantics<parallel>, #tpu.dimension_semantics<arbitrary>], iteration_bounds = array<i64: 1, 1, 1>, scalar_prefetch = 0 : i64, scratch_operands = 1 : i64, tpu.core_type = #tpu.core_type<tc>, window_params = [{transform_indices = @transform_0, window_bounds = array<i64: 2, 8, 32>}, {transform_indices = @transform_1, window_bounds = array<i64: 2, 32>}]} {
    %c0_i32 = arith.constant 0 : i32
    %0 = arith.cmpi eq, %arg2, %c0_i32 : i32
    %1 = arith.extui %0 : i1 to i32
    %c0_i32_0 = arith.constant 0 : i32
    %2 = arith.cmpi ne, %1, %c0_i32_0 : i32
    scf.if %2 {
      %cst_9 = arith.constant 0.000000e+00 : f32
      %11 = vector.broadcast %cst_9 : f32 to vector<2x32xf32>
      %c0_10 = arith.constant 0 : index
      %c0_11 = arith.constant 0 : index
      %12 = vector.load %arg5[%c0_10, %c0_11] : memref<2x32xf32, #tpu.memory_space<vmem>>, vector<2x32xf32>
      tpu.vector_store %arg5[%c0_10, %c0_11], %11 {strides = array<i32>} : memref<2x32xf32, #tpu.memory_space<vmem>>, vector<2x32xf32>,
    } else {
    }
    %c0 = arith.constant 0 : index
    %c0_1 = arith.constant 0 : index
    %c0_2 = arith.constant 0 : index
    %3 = vector.load %arg3[%c0, %c0_1, %c0_2] : memref<2x8x32xf32, #tpu.memory_space<vmem>>, vector<2x8x32xf32>
    %c0_3 = arith.constant 0 : index
    %c0_4 = arith.constant 0 : index
    %4 = vector.load %arg5[%c0_3, %c0_4] : memref<2x32xf32, #tpu.memory_space<vmem>>, vector<2x32xf32>
    %cst = arith.constant dense<0.000000e+00> : vector<2x32xf32>
    %5 = vector.multi_reduction <add>, %3, %cst [1] : vector<2x8x32xf32> to vector<2x32xf32>
    %6 = arith.addf %4, %5 : vector<2x32xf32>
    %c0_5 = arith.constant 0 : index
    %c0_6 = arith.constant 0 : index
    %7 = vector.load %arg5[%c0_5, %c0_6] : memref<2x32xf32, #tpu.memory_space<vmem>>, vector<2x32xf32>
    tpu.vector_store %arg5[%c0_5, %c0_6], %6 {strides = array<i32>} : memref<2x32xf32, #tpu.memory_space<vmem>>, vector<2x32xf32>,
    %c0_i32_7 = arith.constant 0 : i32
    %8 = arith.cmpi eq, %arg2, %c0_i32_7 : i32
    %9 = arith.extui %8 : i1 to i32
    %c0_i32_8 = arith.constant 0 : i32
    %10 = arith.cmpi ne, %9, %c0_i32_8 : i32
    scf.if %10 {
      %c0_9 = arith.constant 0 : index
      %c0_10 = arith.constant 0 : index
      %11 = vector.load %arg5[%c0_9, %c0_10] : memref<2x32xf32, #tpu.memory_space<vmem>>, vector<2x32xf32>
      %cst_11 = arith.constant 1.250000e-01 : f32
      %12 = vector.broadcast %cst_11 : f32 to vector<2x32xf32>
      %13 = arith.mulf %11, %12 : vector<2x32xf32>
      %c0_12 = arith.constant 0 : index
      %c0_13 = arith.constant 0 : index
      %14 = vector.load %arg4[%c0_12, %c0_13] : memref<2x32xf32, #tpu.memory_space<vmem>>, vector<2x32xf32>
      tpu.vector_store %arg4[%c0_12, %c0_13], %13 {strides = array<i32>} : memref<2x32xf32, #tpu.memory_space<vmem>>, vector<2x32xf32>,
    } else {
    }
    return
  }
  func.func @transform_0(%arg0: i32, %arg1: i32, %arg2: i32) -> (i32, i32, i32) {
    %c0_i32 = arith.constant 0 : i32
    return %arg0, %arg2, %arg1 : i32, i32, i32
  }
  func.func @transform_1(%arg0: i32, %arg1: i32, %arg2: i32) -> (i32, i32) {
    %c0_i32 = arith.constant 0 : i32
    return %arg0, %arg1 : i32, i32
  }
}

</mosaic_0001>

<bundles_post_ra>
// kernel: tpu_custom_call.1
= control target key start
LH: loop header
LB: loop body
LE: loop exit
PB: predicated region body
PF: predicated region fallthrough
CT: control target
= control target key end

     0   :  { %6 = vsyncpa [#allocation4], 0  ;;  %s161_s0 = inlined_call_operand.hbm [shape: f32[2,8,32], index: 0, kind: input, shape index: {}]   ;;  %s162_s1 = inlined_call_operand.hbm [shape: f32[2,32], index: 1, kind: output, shape index: {}]  }
   0x1   :  { %7 = vsyncpa [#allocation5], 0  ;;  %s12_s8 = sshll.u32 %s161_s0, 4  ;;  %s137_s9 = smov [#allocation3]   ;;  %s13_s8 = int_to_ptr.hbm [resolvable:$true] %s12_s8 }
   0x2   :  { %s14_s10 = sshll.u32 %s137_s9, 4  ;;  %s138_s11 = smov 128   ;;  %s15_s10 = int_to_ptr.vmem [resolvable:$true] %s14_s10 }
   0x3   :  { %s139_s12 = smov 8  }
   0x4   :  { %20 = dma.hbm_to_vmem [thread:$0]  %s13_s8, 256, %s15_s10, [#allocation4], %s138_s11, %s138_s11, %s139_s12  }
   0x5   :  { %133 = dma.done.wait [#allocation4], 256  }
   0x6   :  { %134 = vsyncadd [#allocation4], 4294967040  ;;  %vm29_vm0 = vcmask 254976   ;;  %v140_v0 = vmov 0.0   ;;  %vm34_vm1 = vcmask 261120   ;;  %v31_v1 = vld [vmem:[#allocation3] sm:$0xff] }
   0x7   :  { %30 = vst.msk [vmem:[#allocation2] sm:$0x3] %vm29_vm0, %v140_v0  ;;  %v32_v2 = vld [vmem:[#allocation3 + $0x8] sm:$0xff]  ;;  %v35_v3 = vsel %vm34_vm1, %v31_v1, 0.0  ;;  %vm51_vm2 = vcmask 1041409   ;;  %s141_s0 = smov [#allocation6]  }
   0x8   :  { %v42_v4 = vsel %vm34_vm1, %v32_v2, 0.0  ;;  %v36_v5 = vrot.slane %v35_v3, 4  ;;  %s68_s13 = sshll.u32 %s141_s0, 4  ;;  %s70_s16 = sshll.u32 %s162_s1, 4  ;;  %s69_s13 = int_to_ptr.vmem [resolvable:$true] %s68_s13  ;;  %s71_s16 = int_to_ptr.hbm [resolvable:$true] %s70_s16 }
   0x9   :  { %v43_v6 = vrot.slane %v42_v4, 4 }
   0xa   :  { %v37_v7 = vadd.f32 %v36_v5, %v35_v3 }
   0xb   :  { %v44_v8 = vadd.f32 %v43_v6, %v42_v4 }
   0xc   :  { %v38_v9 = vrot.slane %v37_v7, 2 }
   0xd   :  { %v45_v10 = vrot.slane %v44_v8, 2 }
   0xe   :  { %v39_v11 = vadd.f32 %v38_v9, %v37_v7  ;;  %v33_v15 = vld [vmem:[#allocation2] sm:$0x3] }
   0xf   :  { %v46_v12 = vadd.f32 %v45_v10, %v44_v8 }
  0x10   :  { %v40_v13 = vrot.slane %v39_v11, 1 }
  0x11   :  { %v47_v14 = vrot.slane %v46_v12, 1 }
  0x12   :  { %v41_v16 = vadd.f32 %v40_v13, %v39_v11 }
  0x13   :  { %v48_v17 = vadd.f32 %v47_v14, %v46_v12 }
  0x15   :  { %v52_v18 = vsel %vm51_vm2, %v48_v17, %v41_v16 }
  0x16   :  { %v54_v19 = vadd.f32 %v52_v18, %v33_v15 }
  0x18   :  { %56 = vst.msk [vmem:[#allocation2] sm:$0x3] %vm29_vm0, %v54_v19 }
  0x1f   :  { %v60_v20 = vld [vmem:[#allocation2] sm:$0x3] }
  0x20   :  { %v61_v21 = vmul.f32 0.125, %v60_v20 }
  0x22   :  { %62 = vst.msk [vmem:[#allocation6] sm:$0x3] %vm29_vm0, %v61_v21 }
  0x23   :  { %73 = dma.vmem_to_hbm [thread:$0]  %s69_s13, 32, %s71_s16, [#allocation5]  }
  0x24   :  { %135 = dma.done.wait [#allocation5], 32  }
  0x25   :  { %136 = vsyncadd [#allocation5], 4294967264 }
  0x26   :  { %78 = vsyncpa [#allocation4], 1 }
  0x27   :  { %79 = vsyncpa [#allocation5], 1 }

</bundles_post_ra>
